<compile_context>
chip_gen: v5e
topology: v5e:2x2
jax: 0.10.0
libtpu: 0.0.40
codegen_flags: <defaults>
</compile_context>

<pallas_src>
import functools

import jax
import jax.numpy as jnp
from jax import lax
from jax.experimental import pallas as pl
from jax.experimental.pallas import tpu as pltpu


def decoder_kernel(xs_ref, h0_ref, c0_ref, wih_ref, whh_ref, b_ref,
                   fc1_w_ref, fc1_b_ref, fc2_w_ref, fc2_b_ref,
                   out_ref, h_out_ref, c_out_ref,
                   xproj_ref, hs_ref):
    """LSTM recurrence with fused gates + hoisted input projection + bulk FC."""
    B, H = h0_ref.shape
    TB = xs_ref.shape[0]
    T = TB // B

    # ---- Input projection (no recurrent dependency): one big matmul, bias
    # folded in once.  xproj layout: rows are (t, b) t-major, cols are 4H with
    # gate order (i, f, o, g).
    xproj_ref[...] = (
        jnp.dot(xs_ref[...], wih_ref[...], preferred_element_type=jnp.float32)
        + b_ref[...])

    # ---- Recurrence.  T is a small static trip count -> fully unrolled.
    # Only ONE MXU matmul (h @ W_hh_fused, N = 4H = 128 lanes) sits on the
    # serial critical path per step.
    h = h0_ref[...]
    c = c0_ref[...]
    whh = whh_ref[...]  # hoist weight load out of the loop
    for t in range(T):
        lo = t * B
        gates = xproj_ref[lo:lo + B, :] + jnp.dot(
            h, whh, preferred_element_type=jnp.float32)          # (B, 4H)
        ifo = jax.nn.sigmoid(gates[:, :3 * H])                    # one wide sigmoid
        g_g = jnp.tanh(gates[:, 3 * H:])                          # one tanh
        i_g = ifo[:, :H]
        f_g = ifo[:, H:2 * H]
        o_g = ifo[:, 2 * H:]
        c = f_g * c + i_g * g_g
        h = o_g * jnp.tanh(c)
        hs_ref[lo:lo + B, :] = h                                  # static-offset store

    h_out_ref[...] = h
    c_out_ref[...] = c

    # ---- fc1 -> fc2 over all timesteps at once: two bulk matmuls and one
    # single output store (replaces 2*T tiny matmuls + T masked partial stores).
    y = jnp.dot(hs_ref[...], fc1_w_ref[...],
                preferred_element_type=jnp.float32) + fc1_b_ref[...]
    y = jnp.dot(y, fc2_w_ref[...],
                preferred_element_type=jnp.float32) + fc2_b_ref[...]
    out_ref[...] = y.astype(out_ref.dtype)


def make_decoder_params(key, output_size, hidden_size, feature_size):
    """Deterministic parameter init mimicking PyTorch shapes (gate order i,f,g,o)."""
    ks = jax.random.split(key, 10)
    H, F, O = hidden_size, feature_size, output_size
    s = 1.0 / jnp.sqrt(jnp.float32(H))
    u = lambda k, shp: jax.random.uniform(k, shp, jnp.float32, -s, s)
    params = {
        "w_ih": u(ks[0], (4 * H, F)),   # PyTorch lstm.weight_ih_l0
        "w_hh": u(ks[1], (4 * H, H)),   # PyTorch lstm.weight_hh_l0
        "b_ih": u(ks[2], (4 * H,)),
        "b_hh": u(ks[3], (4 * H,)),
        "fc1_w": u(ks[4], (H, H)),      # PyTorch fc1.weight
        "fc1_b": u(ks[5], (H,)),
        "fc2_w": u(ks[6], (O, H)),      # PyTorch fc2.weight
        "fc2_b": u(ks[7], (O,)),
    }
    return params


def decoder_forward(params, xs, hidden, cell):
    """xs: (B, T, F); hidden, cell: (1, B, H).  Returns (out, hidden, cell)."""
    B, T, F = xs.shape
    H = hidden.shape[-1]
    O = params["fc2_w"].shape[0]

    # Time-major flatten for the hoisted input projection: (B,T,F) -> (T*B, F).
    xs_flat = jnp.transpose(xs, (1, 0, 2)).reshape(T * B, F)
    h0 = hidden[0]                                # (B, H)
    c0 = cell[0]                                  # (B, H)

    # Fuse gate weights.  PyTorch layout/order is (i, f, g, o); reorder to
    # (i, f, o, g) so the three sigmoid gates are contiguous in the 4H axis.
    # Pre-transpose for x @ W form; combine the two biases once.
    w_ih = params["w_ih"].reshape(4, H, F)
    w_hh = params["w_hh"].reshape(4, H, H)
    b = (params["b_ih"] + params["b_hh"]).reshape(4, H)
    order = (0, 1, 3, 2)                          # i, f, o, g
    wih_f = jnp.concatenate([jnp.transpose(w_ih[g]) for g in order], axis=1)  # (F, 4H)
    whh_f = jnp.concatenate([jnp.transpose(w_hh[g]) for g in order], axis=1)  # (H, 4H)
    b_f = jnp.concatenate([b[g] for g in order], axis=0).reshape(1, 4 * H)    # (1, 4H)

    fc1_w = jnp.transpose(params["fc1_w"])        # (H, H)
    fc1_b = params["fc1_b"].reshape(1, H)
    fc2_w = jnp.transpose(params["fc2_w"])        # (H, O)
    fc2_b = params["fc2_b"].reshape(1, O)

    inputs = [xs_flat, h0, c0, wih_f, whh_f, b_f, fc1_w, fc1_b, fc2_w, fc2_b]

    out_flat, h_out, c_out = pl.pallas_call(
        decoder_kernel,
        out_shape=(
            jax.ShapeDtypeStruct((T * B, O), jnp.float32),
            jax.ShapeDtypeStruct((B, H), jnp.float32),
            jax.ShapeDtypeStruct((B, H), jnp.float32),
        ),
        in_specs=[pl.BlockSpec(memory_space=pltpu.MemorySpace.VMEM)] * len(inputs),
        out_specs=(
            pl.BlockSpec(memory_space=pltpu.MemorySpace.VMEM),
            pl.BlockSpec(memory_space=pltpu.MemorySpace.VMEM),
            pl.BlockSpec(memory_space=pltpu.MemorySpace.VMEM),
        ),
        scratch_shapes=[
            pltpu.VMEM((T * B, 4 * H), jnp.float32),   # hoisted input projection
            pltpu.VMEM((T * B, H), jnp.float32),       # per-step hidden states
        ],
    )(*inputs)

    out = jnp.transpose(out_flat.reshape(T, B, O), (1, 0, 2))   # (B, T, O)
    # output.squeeze(0) in PyTorch is a no-op for B > 1.
    return out, h_out[None], c_out[None]


def decoder_forward_ref(params, xs, hidden, cell):
    """Pure-JAX reference of the PyTorch forward pass (for verification)."""
    B, T, F = xs.shape
    H = hidden.shape[-1]
    w_ih, w_hh = params["w_ih"], params["w_hh"]
    b = params["b_ih"] + params["b_hh"]

    def step(carry, x_t):
        h, c = carry
        gates = x_t @ w_ih.T + h @ w_hh.T + b
        i = jax.nn.sigmoid(gates[:, 0:H])
        f = jax.nn.sigmoid(gates[:, H:2 * H])
        g = jnp.tanh(gates[:, 2 * H:3 * H])
        o = jax.nn.sigmoid(gates[:, 3 * H:4 * H])
        c_new = f * c + i * g
        h_new = o * jnp.tanh(c_new)
        return (h_new, c_new), h_new

    (h_f, c_f), hs = lax.scan(step, (hidden[0], cell[0]),
                              jnp.transpose(xs, (1, 0, 2)))
    lstm_out = jnp.transpose(hs, (1, 0, 2))       # (B, T, H)
    y = lstm_out @ params["fc1_w"].T + params["fc1_b"]
    y = y @ params["fc2_w"].T + params["fc2_b"]
    return y, h_f[None], c_f[None]


if __name__ == "__main__":
    B, T, F, H, O = 2, 8, 16, 32, 16

    key = jax.random.PRNGKey(0)
    kp, kx, kh, kc = jax.random.split(key, 4)
    params = make_decoder_params(kp, output_size=O, hidden_size=H, feature_size=F)

    xs = jax.random.normal(kx, (B, T, F), jnp.float32)
    hidden = jax.random.normal(kh, (1, B, H), jnp.float32)
    cell = jax.random.normal(kc, (1, B, H), jnp.float32)

    out, h_new, c_new = jax.block_until_ready(
        jax.jit(functools.partial(decoder_forward, params))(xs, hidden, cell))

    out_r, h_r, c_r = decoder_forward_ref(params, xs, hidden, cell)
    assert out.shape == (B, T, O) and h_new.shape == (1, B, H) and c_new.shape == (1, B, H)
    assert jnp.allclose(out, out_r, atol=1e-5, rtol=1e-5)
    assert jnp.allclose(h_new, h_r, atol=1e-5, rtol=1e-5)
    assert jnp.allclose(c_new, c_r, atol=1e-5, rtol=1e-5)

    print("KERNEL_OK")
</pallas_src>

<mosaic_0001>
module attributes {stable_mosaic.version = 11 : i64} {
  func.func @decoder_kernel(%arg0: memref<16x16xf32, #tpu.memory_space<vmem>>, %arg1: memref<2x32xf32, #tpu.memory_space<vmem>>, %arg2: memref<2x32xf32, #tpu.memory_space<vmem>>, %arg3: memref<16x128xf32, #tpu.memory_space<vmem>>, %arg4: memref<32x128xf32, #tpu.memory_space<vmem>>, %arg5: memref<1x128xf32, #tpu.memory_space<vmem>>, %arg6: memref<32x32xf32, #tpu.memory_space<vmem>>, %arg7: memref<1x32xf32, #tpu.memory_space<vmem>>, %arg8: memref<32x16xf32, #tpu.memory_space<vmem>>, %arg9: memref<1x16xf32, #tpu.memory_space<vmem>>, %arg10: memref<16x16xf32, #tpu.memory_space<vmem>>, %arg11: memref<2x32xf32, #tpu.memory_space<vmem>>, %arg12: memref<2x32xf32, #tpu.memory_space<vmem>>, %arg13: memref<16x128xf32, #tpu.memory_space<vmem>>, %arg14: memref<16x32xf32, #tpu.memory_space<vmem>>) attributes {dimension_semantics = [], scalar_prefetch = 0 : i64, scratch_operands = 2 : i64, tpu.core_type = #tpu.core_type<tc>} {
    %c0 = arith.constant 0 : index
    %c0_0 = arith.constant 0 : index
    %0 = vector.load %arg0[%c0, %c0_0] : memref<16x16xf32, #tpu.memory_space<vmem>>, vector<16x16xf32>
    %c0_1 = arith.constant 0 : index
    %c0_2 = arith.constant 0 : index
    %1 = vector.load %arg3[%c0_1, %c0_2] : memref<16x128xf32, #tpu.memory_space<vmem>>, vector<16x128xf32>
    %cst = arith.constant dense<0.000000e+00> : vector<16x128xf32>
    %2 = tpu.matmul %0, %1, %cst {dimension_numbers = #tpu.dot_dimension_numbers<[1], [0], [0], [1], [0, 0, 1, 1], [], []>} : vector<16x16xf32>, vector<16x128xf32>, vector<16x128xf32> -> vector<16x128xf32>
    %c0_3 = arith.constant 0 : index
    %c0_4 = arith.constant 0 : index
    %3 = vector.load %arg5[%c0_3, %c0_4] : memref<1x128xf32, #tpu.memory_space<vmem>>, vector<1x128xf32>
    %4 = vector.broadcast %3 : vector<1x128xf32> to vector<16x128xf32>
    %5 = arith.addf %2, %4 : vector<16x128xf32>
    %c0_5 = arith.constant 0 : index
    %c0_6 = arith.constant 0 : index
    %6 = vector.load %arg13[%c0_5, %c0_6] : memref<16x128xf32, #tpu.memory_space<vmem>>, vector<16x128xf32>
    tpu.vector_store %arg13[%c0_5, %c0_6], %5 {strides = array<i32>} : memref<16x128xf32, #tpu.memory_space<vmem>>, vector<16x128xf32>,
    %c0_7 = arith.constant 0 : index
    %c0_8 = arith.constant 0 : index
    %7 = vector.load %arg1[%c0_7, %c0_8] : memref<2x32xf32, #tpu.memory_space<vmem>>, vector<2x32xf32>
    %c0_9 = arith.constant 0 : index
    %c0_10 = arith.constant 0 : index
    %8 = vector.load %arg2[%c0_9, %c0_10] : memref<2x32xf32, #tpu.memory_space<vmem>>, vector<2x32xf32>
    %c0_11 = arith.constant 0 : index
    %c0_12 = arith.constant 0 : index
    %9 = vector.load %arg4[%c0_11, %c0_12] : memref<32x128xf32, #tpu.memory_space<vmem>>, vector<32x128xf32>
    %c0_13 = arith.constant 0 : index
    %c0_14 = arith.constant 0 : index
    %10 = vector.load %arg13[%c0_13, %c0_14] : memref<16x128xf32, #tpu.memory_space<vmem>>, vector<2x128xf32>
    %cst_15 = arith.constant dense<0.000000e+00> : vector<2x128xf32>
    %11 = tpu.matmul %7, %9, %cst_15 {dimension_numbers = #tpu.dot_dimension_numbers<[1], [0], [0], [1], [0, 0, 1, 1], [], []>} : vector<2x32xf32>, vector<32x128xf32>, vector<2x128xf32> -> vector<2x128xf32>
    %12 = arith.addf %10, %11 : vector<2x128xf32>
    %13 = vector.extract_strided_slice %12 {offsets = [0, 0], sizes = [2, 96], strides = [1, 1]} : vector<2x128xf32> to vector<2x96xf32>
    %14 = arith.negf %13 : vector<2x96xf32>
    %15 = math.exp %14 : vector<2x96xf32>
    %cst_16 = arith.constant 1.000000e+00 : f32
    %16 = vector.broadcast %cst_16 : f32 to vector<2x96xf32>
    %17 = arith.addf %16, %15 : vector<2x96xf32>
    %18 = arith.divf %16, %17 : vector<2x96xf32>
    %19 = vector.extract_strided_slice %12 {offsets = [0, 96], sizes = [2, 32], strides = [1, 1]} : vector<2x128xf32> to vector<2x32xf32>
    %20 = math.tanh %19 : vector<2x32xf32>
    %21 = vector.extract_strided_slice %18 {offsets = [0, 0], sizes = [2, 32], strides = [1, 1]} : vector<2x96xf32> to vector<2x32xf32>
    %22 = vector.extract_strided_slice %18 {offsets = [0, 32], sizes = [2, 32], strides = [1, 1]} : vector<2x96xf32> to vector<2x32xf32>
    %23 = vector.extract_strided_slice %18 {offsets = [0, 64], sizes = [2, 32], strides = [1, 1]} : vector<2x96xf32> to vector<2x32xf32>
    %24 = arith.mulf %22, %8 : vector<2x32xf32>
    %25 = arith.mulf %21, %20 : vector<2x32xf32>
    %26 = arith.addf %24, %25 : vector<2x32xf32>
    %27 = math.tanh %26 : vector<2x32xf32>
    %28 = arith.mulf %23, %27 : vector<2x32xf32>
    %c0_17 = arith.constant 0 : index
    %c0_18 = arith.constant 0 : index
    %29 = vector.load %arg14[%c0_17, %c0_18] : memref<16x32xf32, #tpu.memory_space<vmem>>, vector<2x32xf32>
    tpu.vector_store %arg14[%c0_17, %c0_18], %28 {strides = array<i32>} : memref<16x32xf32, #tpu.memory_space<vmem>>, vector<2x32xf32>,
    %c2 = arith.constant 2 : index
    %c0_19 = arith.constant 0 : index
    %30 = vector.load %arg13[%c2, %c0_19] : memref<16x128xf32, #tpu.memory_space<vmem>>, vector<2x128xf32>
    %cst_20 = arith.constant dense<0.000000e+00> : vector<2x128xf32>
    %31 = tpu.matmul %28, %9, %cst_20 {dimension_numbers = #tpu.dot_dimension_numbers<[1], [0], [0], [1], [0, 0, 1, 1], [], []>} : vector<2x32xf32>, vector<32x128xf32>, vector<2x128xf32> -> vector<2x128xf32>
    %32 = arith.addf %30, %31 : vector<2x128xf32>
    %33 = vector.extract_strided_slice %32 {offsets = [0, 0], sizes = [2, 96], strides = [1, 1]} : vector<2x128xf32> to vector<2x96xf32>
    %34 = arith.negf %33 : vector<2x96xf32>
    %35 = math.exp %34 : vector<2x96xf32>
    %cst_21 = arith.constant 1.000000e+00 : f32
    %36 = vector.broadcast %cst_21 : f32 to vector<2x96xf32>
    %37 = arith.addf %36, %35 : vector<2x96xf32>
    %38 = arith.divf %36, %37 : vector<2x96xf32>
    %39 = vector.extract_strided_slice %32 {offsets = [0, 96], sizes = [2, 32], strides = [1, 1]} : vector<2x128xf32> to vector<2x32xf32>
    %40 = math.tanh %39 : vector<2x32xf32>
    %41 = vector.extract_strided_slice %38 {offsets = [0, 0], sizes = [2, 32], strides = [1, 1]} : vector<2x96xf32> to vector<2x32xf32>
    %42 = vector.extract_strided_slice %38 {offsets = [0, 32], sizes = [2, 32], strides = [1, 1]} : vector<2x96xf32> to vector<2x32xf32>
    %43 = vector.extract_strided_slice %38 {offsets = [0, 64], sizes = [2, 32], strides = [1, 1]} : vector<2x96xf32> to vector<2x32xf32>
    %44 = arith.mulf %42, %26 : vector<2x32xf32>
    %45 = arith.mulf %41, %40 : vector<2x32xf32>
    %46 = arith.addf %44, %45 : vector<2x32xf32>
    %47 = math.tanh %46 : vector<2x32xf32>
    %48 = arith.mulf %43, %47 : vector<2x32xf32>
    %c2_22 = arith.constant 2 : index
    %c0_23 = arith.constant 0 : index
    %49 = vector.load %arg14[%c2_22, %c0_23] : memref<16x32xf32, #tpu.memory_space<vmem>>, vector<2x32xf32>
    tpu.vector_store %arg14[%c2_22, %c0_23], %48 {strides = array<i32>} : memref<16x32xf32, #tpu.memory_space<vmem>>, vector<2x32xf32>,
    %c4 = arith.constant 4 : index
    %c0_24 = arith.constant 0 : index
    %50 = vector.load %arg13[%c4, %c0_24] : memref<16x128xf32, #tpu.memory_space<vmem>>, vector<2x128xf32>
    %cst_25 = arith.constant dense<0.000000e+00> : vector<2x128xf32>
    %51 = tpu.matmul %48, %9, %cst_25 {dimension_numbers = #tpu.dot_dimension_numbers<[1], [0], [0], [1], [0, 0, 1, 1], [], []>} : vector<2x32xf32>, vector<32x128xf32>, vector<2x128xf32> -> vector<2x128xf32>
    %52 = arith.addf %50, %51 : vector<2x128xf32>
    %53 = vector.extract_strided_slice %52 {offsets = [0, 0], sizes = [2, 96], strides = [1, 1]} : vector<2x128xf32> to vector<2x96xf32>
    %54 = arith.negf %53 : vector<2x96xf32>
    %55 = math.exp %54 : vector<2x96xf32>
    %cst_26 = arith.constant 1.000000e+00 : f32
    %56 = vector.broadcast %cst_26 : f32 to vector<2x96xf32>
    %57 = arith.addf %56, %55 : vector<2x96xf32>
    %58 = arith.divf %56, %57 : vector<2x96xf32>
    %59 = vector.extract_strided_slice %52 {offsets = [0, 96], sizes = [2, 32], strides = [1, 1]} : vector<2x128xf32> to vector<2x32xf32>
    %60 = math.tanh %59 : vector<2x32xf32>
    %61 = vector.extract_strided_slice %58 {offsets = [0, 0], sizes = [2, 32], strides = [1, 1]} : vector<2x96xf32> to vector<2x32xf32>
    %62 = vector.extract_strided_slice %58 {offsets = [0, 32], sizes = [2, 32], strides = [1, 1]} : vector<2x96xf32> to vector<2x32xf32>
    %63 = vector.extract_strided_slice %58 {offsets = [0, 64], sizes = [2, 32], strides = [1, 1]} : vector<2x96xf32> to vector<2x32xf32>
    %64 = arith.mulf %62, %46 : vector<2x32xf32>
    %65 = arith.mulf %61, %60 : vector<2x32xf32>
    %66 = arith.addf %64, %65 : vector<2x32xf32>
    %67 = math.tanh %66 : vector<2x32xf32>
    %68 = arith.mulf %63, %67 : vector<2x32xf32>
    %c4_27 = arith.constant 4 : index
    %c0_28 = arith.constant 0 : index
    %69 = vector.load %arg14[%c4_27, %c0_28] : memref<16x32xf32, #tpu.memory_space<vmem>>, vector<2x32xf32>
    tpu.vector_store %arg14[%c4_27, %c0_28], %68 {strides = array<i32>} : memref<16x32xf32, #tpu.memory_space<vmem>>, vector<2x32xf32>,
    %c6 = arith.constant 6 : index
    %c0_29 = arith.constant 0 : index
    %70 = vector.load %arg13[%c6, %c0_29] : memref<16x128xf32, #tpu.memory_space<vmem>>, vector<2x128xf32>
    %cst_30 = arith.constant dense<0.000000e+00> : vector<2x128xf32>
    %71 = tpu.matmul %68, %9, %cst_30 {dimension_numbers = #tpu.dot_dimension_numbers<[1], [0], [0], [1], [0, 0, 1, 1], [], []>} : vector<2x32xf32>, vector<32x128xf32>, vector<2x128xf32> -> vector<2x128xf32>
    %72 = arith.addf %70, %71 : vector<2x128xf32>
    %73 = vector.extract_strided_slice %72 {offsets = [0, 0], sizes = [2, 96], strides = [1, 1]} : vector<2x128xf32> to vector<2x96xf32>
    %74 = arith.negf %73 : vector<2x96xf32>
    %75 = math.exp %74 : vector<2x96xf32>
    %cst_31 = arith.constant 1.000000e+00 : f32
    %76 = vector.broadcast %cst_31 : f32 to vector<2x96xf32>
    %77 = arith.addf %76, %75 : vector<2x96xf32>
    %78 = arith.divf %76, %77 : vector<2x96xf32>
    %79 = vector.extract_strided_slice %72 {offsets = [0, 96], sizes = [2, 32], strides = [1, 1]} : vector<2x128xf32> to vector<2x32xf32>
    %80 = math.tanh %79 : vector<2x32xf32>
    %81 = vector.extract_strided_slice %78 {offsets = [0, 0], sizes = [2, 32], strides = [1, 1]} : vector<2x96xf32> to vector<2x32xf32>
    %82 = vector.extract_strided_slice %78 {offsets = [0, 32], sizes = [2, 32], strides = [1, 1]} : vector<2x96xf32> to vector<2x32xf32>
    %83 = vector.extract_strided_slice %78 {offsets = [0, 64], sizes = [2, 32], strides = [1, 1]} : vector<2x96xf32> to vector<2x32xf32>
    %84 = arith.mulf %82, %66 : vector<2x32xf32>
    %85 = arith.mulf %81, %80 : vector<2x32xf32>
    %86 = arith.addf %84, %85 : vector<2x32xf32>
    %87 = math.tanh %86 : vector<2x32xf32>
    %88 = arith.mulf %83, %87 : vector<2x32xf32>
    %c6_32 = arith.constant 6 : index
    %c0_33 = arith.constant 0 : index
    %89 = vector.load %arg14[%c6_32, %c0_33] : memref<16x32xf32, #tpu.memory_space<vmem>>, vector<2x32xf32>
    tpu.vector_store %arg14[%c6_32, %c0_33], %88 {strides = array<i32>} : memref<16x32xf32, #tpu.memory_space<vmem>>, vector<2x32xf32>,
    %c8 = arith.constant 8 : index
    %c0_34 = arith.constant 0 : index
    %90 = vector.load %arg13[%c8, %c0_34] : memref<16x128xf32, #tpu.memory_space<vmem>>, vector<2x128xf32>
    %cst_35 = arith.constant dense<0.000000e+00> : vector<2x128xf32>
    %91 = tpu.matmul %88, %9, %cst_35 {dimension_numbers = #tpu.dot_dimension_numbers<[1], [0], [0], [1], [0, 0, 1, 1], [], []>} : vector<2x32xf32>, vector<32x128xf32>, vector<2x128xf32> -> vector<2x128xf32>
    %92 = arith.addf %90, %91 : vector<2x128xf32>
    %93 = vector.extract_strided_slice %92 {offsets = [0, 0], sizes = [2, 96], strides = [1, 1]} : vector<2x128xf32> to vector<2x96xf32>
    %94 = arith.negf %93 : vector<2x96xf32>
    %95 = math.exp %94 : vector<2x96xf32>
    %cst_36 = arith.constant 1.000000e+00 : f32
    %96 = vector.broadcast %cst_36 : f32 to vector<2x96xf32>
    %97 = arith.addf %96, %95 : vector<2x96xf32>
    %98 = arith.divf %96, %97 : vector<2x96xf32>
    %99 = vector.extract_strided_slice %92 {offsets = [0, 96], sizes = [2, 32], strides = [1, 1]} : vector<2x128xf32> to vector<2x32xf32>
    %100 = math.tanh %99 : vector<2x32xf32>
    %101 = vector.extract_strided_slice %98 {offsets = [0, 0], sizes = [2, 32], strides = [1, 1]} : vector<2x96xf32> to vector<2x32xf32>
    %102 = vector.extract_strided_slice %98 {offsets = [0, 32], sizes = [2, 32], strides = [1, 1]} : vector<2x96xf32> to vector<2x32xf32>
    %103 = vector.extract_strided_slice %98 {offsets = [0, 64], sizes = [2, 32], strides = [1, 1]} : vector<2x96xf32> to vector<2x32xf32>
    %104 = arith.mulf %102, %86 : vector<2x32xf32>
    %105 = arith.mulf %101, %100 : vector<2x32xf32>
    %106 = arith.addf %104, %105 : vector<2x32xf32>
    %107 = math.tanh %106 : vector<2x32xf32>
    %108 = arith.mulf %103, %107 : vector<2x32xf32>
    %c8_37 = arith.constant 8 : index
    %c0_38 = arith.constant 0 : index
    %109 = vector.load %arg14[%c8_37, %c0_38] : memref<16x32xf32, #tpu.memory_space<vmem>>, vector<2x32xf32>
    tpu.vector_store %arg14[%c8_37, %c0_38], %108 {strides = array<i32>} : memref<16x32xf32, #tpu.memory_space<vmem>>, vector<2x32xf32>,
    %c10 = arith.constant 10 : index
    %c0_39 = arith.constant 0 : index
    %110 = vector.load %arg13[%c10, %c0_39] : memref<16x128xf32, #tpu.memory_space<vmem>>, vector<2x128xf32>
    %cst_40 = arith.constant dense<0.000000e+00> : vector<2x128xf32>
    %111 = tpu.matmul %108, %9, %cst_40 {dimension_numbers = #tpu.dot_dimension_numbers<[1], [0], [0], [1], [0, 0, 1, 1], [], []>} : vector<2x32xf32>, vector<32x128xf32>, vector<2x128xf32> -> vector<2x128xf32>
    %112 = arith.addf %110, %111 : vector<2x128xf32>
    %113 = vector.extract_strided_slice %112 {offsets = [0, 0], sizes = [2, 96], strides = [1, 1]} : vector<2x128xf32> to vector<2x96xf32>
    %114 = arith.negf %113 : vector<2x96xf32>
    %115 = math.exp %114 : vector<2x96xf32>
    %cst_41 = arith.constant 1.000000e+00 : f32
    %116 = vector.broadcast %cst_41 : f32 to vector<2x96xf32>
    %117 = arith.addf %116, %115 : vector<2x96xf32>
    %118 = arith.divf %116, %117 : vector<2x96xf32>
    %119 = vector.extract_strided_slice %112 {offsets = [0, 96], sizes = [2, 32], strides = [1, 1]} : vector<2x128xf32> to vector<2x32xf32>
    %120 = math.tanh %119 : vector<2x32xf32>
    %121 = vector.extract_strided_slice %118 {offsets = [0, 0], sizes = [2, 32], strides = [1, 1]} : vector<2x96xf32> to vector<2x32xf32>
    %122 = vector.extract_strided_slice %118 {offsets = [0, 32], sizes = [2, 32], strides = [1, 1]} : vector<2x96xf32> to vector<2x32xf32>
    %123 = vector.extract_strided_slice %118 {offsets = [0, 64], sizes = [2, 32], strides = [1, 1]} : vector<2x96xf32> to vector<2x32xf32>
    %124 = arith.mulf %122, %106 : vector<2x32xf32>
    %125 = arith.mulf %121, %120 : vector<2x32xf32>
    %126 = arith.addf %124, %125 : vector<2x32xf32>
    %127 = math.tanh %126 : vector<2x32xf32>
    %128 = arith.mulf %123, %127 : vector<2x32xf32>
    %c10_42 = arith.constant 10 : index
    %c0_43 = arith.constant 0 : index
    %129 = vector.load %arg14[%c10_42, %c0_43] : memref<16x32xf32, #tpu.memory_space<vmem>>, vector<2x32xf32>
    tpu.vector_store %arg14[%c10_42, %c0_43], %128 {strides = array<i32>} : memref<16x32xf32, #tpu.memory_space<vmem>>, vector<2x32xf32>,
    %c12 = arith.constant 12 : index
    %c0_44 = arith.constant 0 : index
    %130 = vector.load %arg13[%c12, %c0_44] : memref<16x128xf32, #tpu.memory_space<vmem>>, vector<2x128xf32>
    %cst_45 = arith.constant dense<0.000000e+00> : vector<2x128xf32>
    %131 = tpu.matmul %128, %9, %cst_45 {dimension_numbers = #tpu.dot_dimension_numbers<[1], [0], [0], [1], [0, 0, 1, 1], [], []>} : vector<2x32xf32>, vector<32x128xf32>, vector<2x128xf32> -> vector<2x128xf32>
    %132 = arith.addf %130, %131 : vector<2x128xf32>
    %133 = vector.extract_strided_slice %132 {offsets = [0, 0], sizes = [2, 96], strides = [1, 1]} : vector<2x128xf32> to vector<2x96xf32>
    %134 = arith.negf %133 : vector<2x96xf32>
    %135 = math.exp %134 : vector<2x96xf32>
    %cst_46 = arith.constant 1.000000e+00 : f32
    %136 = vector.broadcast %cst_46 : f32 to vector<2x96xf32>
    %137 = arith.addf %136, %135 : vector<2x96xf32>
    %138 = arith.divf %136, %137 : vector<2x96xf32>
    %139 = vector.extract_strided_slice %132 {offsets = [0, 96], sizes = [2, 32], strides = [1, 1]} : vector<2x128xf32> to vector<2x32xf32>
    %140 = math.tanh %139 : vector<2x32xf32>
    %141 = vector.extract_strided_slice %138 {offsets = [0, 0], sizes = [2, 32], strides = [1, 1]} : vector<2x96xf32> to vector<2x32xf32>
    %142 = vector.extract_strided_slice %138 {offsets = [0, 32], sizes = [2, 32], strides = [1, 1]} : vector<2x96xf32> to vector<2x32xf32>
    %143 = vector.extract_strided_slice %138 {offsets = [0, 64], sizes = [2, 32], strides = [1, 1]} : vector<2x96xf32> to vector<2x32xf32>
    %144 = arith.mulf %142, %126 : vector<2x32xf32>
    %145 = arith.mulf %141, %140 : vector<2x32xf32>
    %146 = arith.addf %144, %145 : vector<2x32xf32>
    %147 = math.tanh %146 : vector<2x32xf32>
    %148 = arith.mulf %143, %147 : vector<2x32xf32>
    %c12_47 = arith.constant 12 : index
    %c0_48 = arith.constant 0 : index
    %149 = vector.load %arg14[%c12_47, %c0_48] : memref<16x32xf32, #tpu.memory_space<vmem>>, vector<2x32xf32>
    tpu.vector_store %arg14[%c12_47, %c0_48], %148 {strides = array<i32>} : memref<16x32xf32, #tpu.memory_space<vmem>>, vector<2x32xf32>,
    %c14 = arith.constant 14 : index
    %c0_49 = arith.constant 0 : index
    %150 = vector.load %arg13[%c14, %c0_49] : memref<16x128xf32, #tpu.memory_space<vmem>>, vector<2x128xf32>
    %cst_50 = arith.constant dense<0.000000e+00> : vector<2x128xf32>
    %151 = tpu.matmul %148, %9, %cst_50 {dimension_numbers = #tpu.dot_dimension_numbers<[1], [0], [0], [1], [0, 0, 1, 1], [], []>} : vector<2x32xf32>, vector<32x128xf32>, vector<2x128xf32> -> vector<2x128xf32>
    %152 = arith.addf %150, %151 : vector<2x128xf32>
    %153 = vector.extract_strided_slice %152 {offsets = [0, 0], sizes = [2, 96], strides = [1, 1]} : vector<2x128xf32> to vector<2x96xf32>
    %154 = arith.negf %153 : vector<2x96xf32>
    %155 = math.exp %154 : vector<2x96xf32>
    %cst_51 = arith.constant 1.000000e+00 : f32
    %156 = vector.broadcast %cst_51 : f32 to vector<2x96xf32>
    %157 = arith.addf %156, %155 : vector<2x96xf32>
    %158 = arith.divf %156, %157 : vector<2x96xf32>
    %159 = vector.extract_strided_slice %152 {offsets = [0, 96], sizes = [2, 32], strides = [1, 1]} : vector<2x128xf32> to vector<2x32xf32>
    %160 = math.tanh %159 : vector<2x32xf32>
    %161 = vector.extract_strided_slice %158 {offsets = [0, 0], sizes = [2, 32], strides = [1, 1]} : vector<2x96xf32> to vector<2x32xf32>
    %162 = vector.extract_strided_slice %158 {offsets = [0, 32], sizes = [2, 32], strides = [1, 1]} : vector<2x96xf32> to vector<2x32xf32>
    %163 = vector.extract_strided_slice %158 {offsets = [0, 64], sizes = [2, 32], strides = [1, 1]} : vector<2x96xf32> to vector<2x32xf32>
    %164 = arith.mulf %162, %146 : vector<2x32xf32>
    %165 = arith.mulf %161, %160 : vector<2x32xf32>
    %166 = arith.addf %164, %165 : vector<2x32xf32>
    %167 = math.tanh %166 : vector<2x32xf32>
    %168 = arith.mulf %163, %167 : vector<2x32xf32>
    %c14_52 = arith.constant 14 : index
    %c0_53 = arith.constant 0 : index
    %169 = vector.load %arg14[%c14_52, %c0_53] : memref<16x32xf32, #tpu.memory_space<vmem>>, vector<2x32xf32>
    tpu.vector_store %arg14[%c14_52, %c0_53], %168 {strides = array<i32>} : memref<16x32xf32, #tpu.memory_space<vmem>>, vector<2x32xf32>,
    %c0_54 = arith.constant 0 : index
    %c0_55 = arith.constant 0 : index
    %170 = vector.load %arg11[%c0_54, %c0_55] : memref<2x32xf32, #tpu.memory_space<vmem>>, vector<2x32xf32>
    tpu.vector_store %arg11[%c0_54, %c0_55], %168 {strides = array<i32>} : memref<2x32xf32, #tpu.memory_space<vmem>>, vector<2x32xf32>,
    %c0_56 = arith.constant 0 : index
    %c0_57 = arith.constant 0 : index
    %171 = vector.load %arg12[%c0_56, %c0_57] : memref<2x32xf32, #tpu.memory_space<vmem>>, vector<2x32xf32>
    tpu.vector_store %arg12[%c0_56, %c0_57], %166 {strides = array<i32>} : memref<2x32xf32, #tpu.memory_space<vmem>>, vector<2x32xf32>,
    %c0_58 = arith.constant 0 : index
    %c0_59 = arith.constant 0 : index
    %172 = vector.load %arg14[%c0_58, %c0_59] : memref<16x32xf32, #tpu.memory_space<vmem>>, vector<16x32xf32>
    %c0_60 = arith.constant 0 : index
    %c0_61 = arith.constant 0 : index
    %173 = vector.load %arg6[%c0_60, %c0_61] : memref<32x32xf32, #tpu.memory_space<vmem>>, vector<32x32xf32>
    %cst_62 = arith.constant dense<0.000000e+00> : vector<16x32xf32>
    %174 = tpu.matmul %172, %173, %cst_62 {dimension_numbers = #tpu.dot_dimension_numbers<[1], [0], [0], [1], [0, 0, 1, 1], [], []>} : vector<16x32xf32>, vector<32x32xf32>, vector<16x32xf32> -> vector<16x32xf32>
    %c0_63 = arith.constant 0 : index
    %c0_64 = arith.constant 0 : index
    %175 = vector.load %arg7[%c0_63, %c0_64] : memref<1x32xf32, #tpu.memory_space<vmem>>, vector<1x32xf32>
    %176 = vector.broadcast %175 : vector<1x32xf32> to vector<16x32xf32>
    %177 = arith.addf %174, %176 : vector<16x32xf32>
    %c0_65 = arith.constant 0 : index
    %c0_66 = arith.constant 0 : index
    %178 = vector.load %arg8[%c0_65, %c0_66] : memref<32x16xf32, #tpu.memory_space<vmem>>, vector<32x16xf32>
    %cst_67 = arith.constant dense<0.000000e+00> : vector<16x16xf32>
    %179 = tpu.matmul %177, %178, %cst_67 {dimension_numbers = #tpu.dot_dimension_numbers<[1], [0], [0], [1], [0, 0, 1, 1], [], []>} : vector<16x32xf32>, vector<32x16xf32>, vector<16x16xf32> -> vector<16x16xf32>
    %c0_68 = arith.constant 0 : index
    %c0_69 = arith.constant 0 : index
    %180 = vector.load %arg9[%c0_68, %c0_69] : memref<1x16xf32, #tpu.memory_space<vmem>>, vector<1x16xf32>
    %181 = vector.broadcast %180 : vector<1x16xf32> to vector<16x16xf32>
    %182 = arith.addf %179, %181 : vector<16x16xf32>
    %c0_70 = arith.constant 0 : index
    %c0_71 = arith.constant 0 : index
    %183 = vector.load %arg10[%c0_70, %c0_71] : memref<16x16xf32, #tpu.memory_space<vmem>>, vector<16x16xf32>
    tpu.vector_store %arg10[%c0_70, %c0_71], %182 {strides = array<i32>} : memref<16x16xf32, #tpu.memory_space<vmem>>, vector<16x16xf32>,
    return
  }
}

</mosaic_0001>

<bundles_post_ra>
// kernel: decoder_forward.1
= control target key start
LH: loop header
LB: loop body
LE: loop exit
PB: predicated region body
PF: predicated region fallthrough
CT: control target
= control target key end

     0   :  { %18 = vsyncpa [#allocation5], 0  ;;  %s1213_s0 = inlined_call_operand.vmem [shape: f32[16,16], index: 0, kind: input, shape index: {}]   ;;  %s1214_s1 = inlined_call_operand.vmem [shape: f32[2,32], index: 1, kind: input, shape index: {}]   ;;  %s1215_s2 = inlined_call_operand.vmem [shape: f32[2,32], index: 2, kind: input, shape index: {}]   ;;  %s1216_s3 = inlined_call_operand.hbm [shape: f32[16,128], index: 3, kind: input, shape index: {}]   ;;  %s1217_s4 = inlined_call_operand.vmem [shape: f32[32,128], index: 4, kind: input, shape index: {}]   ;;  %s1218_s5 = inlined_call_operand.vmem [shape: f32[1,128], index: 5, kind: input, shape index: {}]   ;;  %s1219_s6 = inlined_call_operand.hbm [shape: f32[32,32], index: 6, kind: input, shape index: {}]   ;;  %s1220_s7 = inlined_call_operand.vmem [shape: f32[1,32], index: 7, kind: input, shape index: {}]   ;;  %s1221_s8 = inlined_call_operand.hbm [shape: f32[32,16], index: 8, kind: input, shape index: {}]   ;;  %s1222_s9 = inlined_call_operand.vmem [shape: f32[1,16], index: 9, kind: input, shape index: {}]   ;;  %s1223_s10 = inlined_call_operand.vmem [shape: f32[16,16], index: 10, kind: output, shape index: {0}]   ;;  %s1224_s11 = inlined_call_operand.hbm [shape: f32[2,32], index: 11, kind: output, shape index: {1}]   ;;  %s1225_s12 = inlined_call_operand.hbm [shape: f32[2,32], index: 12, kind: output, shape index: {2}]  }
   0x1   :  { %19 = vsyncpa [#allocation8], 0 }
   0x2   :  { %20 = vsyncpa [#allocation6], 0 }
   0x3   :  { %21 = vsyncpa [#allocation12], 0  ;;  %s49_s23 = sshll.u32 %s1219_s6, 4  ;;  %s1017_s24 = smov [#allocation7]   ;;  %s50_s23 = int_to_ptr.hbm [resolvable:$true] %s49_s23 }
   0x4   :  { %s51_s25 = sshll.u32 %s1017_s24, 4  ;;  %s32_s28 = sshll.u32 %s1216_s3, 4  ;;  %s52_s25 = int_to_ptr.vmem [resolvable:$true] %s51_s25  ;;  %s33_s28 = int_to_ptr.hbm [resolvable:$true] %s32_s28 }
   0x5   :  { %s1018_s29 = smov 128   ;;  %s1019_s30 = smov 8  }
   0x6   :  { %57 = dma.hbm_to_vmem [thread:$0]  %s50_s23, 512, %s52_s25, [#allocation8], %s1018_s29, %s1018_s29, %s1019_s30  }
   0x7   :  { %s1020_s13 = smov [#allocation4]   ;;  %s64_s17 = sshll.u32 %s1221_s8, 4  ;;  %s65_s17 = int_to_ptr.hbm [resolvable:$true] %s64_s17 }
   0x8   :  { %s34_s14 = sshll.u32 %s1020_s13, 4  ;;  %s1021_s6 = smov [#allocation9]   ;;  %s35_s14 = int_to_ptr.vmem [resolvable:$true] %s34_s14 }
   0x9   :  { %40 = dma.hbm_to_vmem [thread:$0]  %s33_s28, 256, %s35_s14, [#allocation5], %s1018_s29, %s1018_s29, %s1019_s30  }
   0xa   :  { %s66_s18 = sshll.u32 %s1021_s6, 4  ;;  %s67_s18 = int_to_ptr.vmem [resolvable:$true] %s66_s18 }
   0xb   :  { %72 = dma.hbm_to_vmem [thread:$0]  %s65_s17, 512, %s67_s18, [#allocation8], %s1018_s29, %s1018_s29, %s1019_s30  }
   0xc   :  { %1009 = dma.done.wait [#allocation5], 256  }
   0xd   :  { %1010 = vsyncadd [#allocation5], 4294967040 }
   0xe   :  { %1011 = dma.done.wait [#allocation8], 1024  }
   0xf   :  { %1012 = vsyncadd [#allocation8], 4294966272  ;;  %v90_v0 = vld [vmem:[#allocation4 + $0x8] sm:$0xff]  ;;  %v89_v1 = vld [vmem:[#allocation4] sm:$0xff]  ;;  %vm95_vm0 = vcmask 130048   ;;  %vm134_vm1 = vcmask 261120  }
  0x10   :  { %116 = vmatpush.msra.mxu0 %v90_v0  ;;  %v87_v2 = vld [vmem:[%s1213_s0] sm:$0xff]  ;;  %v132_v3 = vld [vmem:[%s1217_s4 + $0x18] sm:$0xff]  ;;  %v131_v4 = vld [vmem:[%s1217_s4 + $0x10] sm:$0xff]  ;;  %s1022_s29 = smov 32   ;;  %s1023_s14 = smov 64   ;;  %vm204_vm6 = vcmask 254976  }
  0x11   :  { %150 = vmatpush.msra.mxu1 %v132_v3  ;;  %287 = vmatpush.msra.mxu3 %v132_v3  ;;  %v130_v5 = vld [vmem:[%s1217_s4 + $0x8] sm:$0xff]  ;;  %v129_v6 = vld [vmem:[%s1217_s4] sm:$0xff]  ;;  %s1025_s18 = smov [#allocation10]   ;;  %s761_s20 = sshll.u32 %s1224_s11, 4  ;;  %s762_s20 = int_to_ptr.hbm [resolvable:$true] %s761_s20 }
  0x12   :  { %117 = vmatpush.msra.mxu0 %v89_v1  ;;  %419 = vmatpush.msra.mxu2 %v132_v3  ;;  %v127_v7 = vld [vmem:[%s1214_s1] sm:$0x3]  ;;  %v88_v36 = vld [vmem:[%s1213_s0 + $0x8] sm:$0xff]  ;;  %s759_s3 = sshll.u32 %s1025_s18, 4  ;;  %s1026_s21 = smov [#allocation11]   ;;  %s760_s3 = int_to_ptr.vmem [resolvable:$true] %s759_s3 }
  0x13   :  { %790 = vmatmul.msk.f32.vlgmr.msra.gmra.mxu0 %vm95_vm0, %v87_v2  ;;  %151 = vmatpush.msra.mxu1 %v131_v4  ;;  %v822_v8 = vld [vmem:[%s1218_s5] ss:$0 sm:$0xff]  ;;  %s770_s22 = sshll.u32 %s1026_s21, 4  ;;  %s772_s25 = sshll.u32 %s1225_s12, 4  ;;  %s771_s22 = int_to_ptr.vmem [resolvable:$true] %s770_s22  ;;  %s773_s25 = int_to_ptr.hbm [resolvable:$true] %s772_s25 }
  0x14   :  { %221 = vmatpush.msrb.mxu0 %v132_v3  ;;  %288 = vmatpush.msra.mxu3 %v131_v4  ;;  %v128_v15 = vld [vmem:[%s1215_s2] sm:$0x3] }
  0x15   :  { %152 = vmatpush.msra.mxu1 %v130_v5  ;;  %420 = vmatpush.msra.mxu2 %v131_v4 }
  0x16   :  { %222 = vmatpush.msrb.mxu0 %v131_v4  ;;  %289 = vmatpush.msra.mxu3 %v130_v5 }
  0x17   :  { %153 = vmatpush.msra.mxu1 %v129_v6  ;;  %421 = vmatpush.msra.mxu2 %v130_v5 }
  0x18   :  { %792 = vmatmul.msk.f32.vlgmr.msra.gmra.mxu1 %vm134_vm1, %v127_v7  ;;  %223 = vmatpush.msrb.mxu0 %v130_v5 }
  0x19   :  { %290 = vmatpush.msra.mxu3 %v129_v6  ;;  %353 = vmatpush.msrb.mxu1 %v132_v3 }
  0x1a   :  { %224 = vmatpush.msrb.mxu0 %v129_v6  ;;  %422 = vmatpush.msra.mxu2 %v129_v6 }
  0x1b   :  { %354 = vmatpush.msrb.mxu1 %v131_v4  ;;  %485 = vmatpush.msrb.mxu3 %v132_v3 }
  0x1c   :  { %551 = vmatpush.msra.mxu0 %v132_v3 }
  0x1d   :  { %355 = vmatpush.msrb.mxu1 %v130_v5  ;;  %486 = vmatpush.msrb.mxu3 %v131_v4 }
  0x1e   :  { %552 = vmatpush.msra.mxu0 %v131_v4 }
  0x1f   :  { %356 = vmatpush.msrb.mxu1 %v129_v6  ;;  %487 = vmatpush.msrb.mxu3 %v130_v5 }
  0x20   :  { %553 = vmatpush.msra.mxu0 %v130_v5 }
  0x21   :  { %617 = vmatpush.msra.mxu1 %v132_v3  ;;  %488 = vmatpush.msrb.mxu3 %v129_v6 }
  0x22   :  { %554 = vmatpush.msra.mxu0 %v129_v6 }
  0x23   :  { %618 = vmatpush.msra.mxu1 %v131_v4  ;;  %791 = vmatmul.msk.f32.gmra.mxu0 %vm95_vm0, %v88_v36 }
  0x25   :  { %619 = vmatpush.msra.mxu1 %v130_v5 }
  0x27   :  { %620 = vmatpush.msra.mxu1 %v129_v6 }
  0x90   :  { %v119_v9 = vpop.f32.mrf.mxu0 }
  0x91   :  { %v120_v10 = vadd.f32 %v822_v8, %v119_v9 }
  0x93   :  { %125 = vst [vmem:[#allocation2] sm:$0xff] %v120_v10 }
  0x95   :  { %v155_v11 = vpop.f32.mrf.mxu1 }
  0x9a   :  { %v133_v12 = vld [vmem:[#allocation2] sm:$0x3]  ;;  %v206_v42 = vld [vmem:[#allocation2 + $0x2] sm:$0x3]  ;;  %v272_v4 = vld [vmem:[#allocation2 + $0x4] sm:$0x3] }
  0x9b   :  { %v158_v13 = vadd.f32 %v155_v11, %v133_v12 }
  0x9d   :  { %825 = vtanh.f32 %v158_v13  ;;  %v793_v16 = vmul.f32 -1.442695, %v158_v13 }
  0x9f   :  { %827 = vpow2.f32 %v793_v16 }
  0xa0   :  { %v122_v40 = vpop.f32.mrf.mxu0 }
  0xa1   :  { %v123_v41 = vadd.f32 %v822_v8, %v122_v40 }
  0xa3   :  { %v826_v14 = vpop.eup %825  ;;  %126 = vst [vmem:[#allocation2 + $0x8] sm:$0xff] %v123_v41 }
  0xa4   :  { %185 = vrot.lane.b32.xlu0 %v826_v14, %s1022_s29 }
  0xa5   :  { %v828_v17 = vpop.eup %827 }
  0xa6   :  { %v162_v18 = vadd.f32 1.0, %v828_v17 }
  0xa8   :  { %829 = vrcp.f32 %v162_v18  ;;  %v174_v24 = vand.u32 2147483648, %v162_v18  ;;  %vm168_vm3 = vweird.f32 %v162_v18  ;;  %v172_v25 = vand.u32 2147483647, %v162_v18 }
  0xaa   :  { %v175_v27 = vor.u32 1.1754944e-38, %v174_v24  ;;  %vm173_vm5 = vcmp.eq.f32.partialorder %v172_v25, 8.507059e+37 }
  0xac   :  { %180 = vrot.lane.b32.xlu0 %v128_v15, %s1022_s29 }
  0xae   :  { %v830_v19 = vpop.eup %829 }
  0xaf   :  { %v164_v20 = vmul.f32 %v830_v19, %v162_v18  ;;  %vm169_vm2 = vweird.f32 %v830_v19 }
  0xb0   :  { %vm170_vm4 = vmor %vm168_vm3, %vm169_vm2 }
  0xb1   :  { %v165_v21 = vsub.f32 1.0, %v164_v20 }
  0xb3   :  { %v166_v22 = vmul.f32 %v830_v19, %v165_v21 }
  0xb5   :  { %v167_v23 = vadd.f32 %v830_v19, %v166_v22 }
  0xb7   :  { %v171_v26 = vsel %vm170_vm4, %v830_v19, %v167_v23 }
  0xb8   :  { %v176_v29 = vsel %vm173_vm5, %v175_v27, %v171_v26 }
 0x116   :  { %v186_v28 = vpop.permute.xlu0 %185 }
 0x117   :  { %v188_v30 = vmul.f32 %v186_v28, %v176_v29 }
 0x119   :  { %190 = vrot.lane.b32.xlu1 %v188_v30, %s1022_s29  ;;  %v338_v30 = vld [vmem:[#allocation2 + $0x6] sm:$0x3] }
 0x11e   :  { %v181_v31 = vpop.permute.xlu0 %180 }
 0x11f   :  { %v183_v32 = vmul.f32 %v181_v31, %v176_v29 }
 0x18b   :  { %v191_v33 = vpop.permute.xlu1 %190 }
 0x18c   :  { %v193_v34 = vadd.f32 %v191_v33, %v183_v32 }
 0x18e   :  { %831 = vtanh.f32 %v193_v34 }
 0x194   :  { %v832_v35 = vpop.eup %831 }
 0x195   :  { %196 = vrot.lane.b32.xlu1 %v832_v35, %s1022_s29 }
 0x207   :  { %v197_v37 = vpop.permute.xlu1 %196 }
 0x208   :  { %v199_v38 = vmul.f32 %v197_v37, %v176_v29 }
 0x20a   :  { %201 = vrot.lane.b32.xlu2 %v199_v38, %s1023_s14 }
 0x264   :  { %v202_v39 = vpop.permute.xlu2 %201 }
 0x265   :  { %205 = vst.msk [vmem:[#allocation3] sm:$0x3] %vm204_vm6, %v202_v39  ;;  %794 = vmatmul.msk.f32.vlgmr.msrb.gmra.mxu0 %vm134_vm1, %v202_v39 }
 0x2e2   :  { %v226_v43 = vpop.f32.mrf.mxu0 }
 0x2e3   :  { %v229_v44 = vadd.f32 %v226_v43, %v206_v42 }
 0x2e5   :  { %833 = vtanh.f32 %v229_v44  ;;  %v795_v46 = vmul.f32 -1.442695, %v229_v44 }
 0x2e7   :  { %835 = vpow2.f32 %v795_v46 }
 0x2eb   :  { %v834_v45 = vpop.eup %833 }
 0x2ec   :  { %252 = vrot.lane.b32.xlu2 %v834_v45, %s1022_s29 }
 0x2ed   :  { %v836_v47 = vpop.eup %835 }
 0x2ee   :  { %v233_v48 = vadd.f32 1.0, %v836_v47 }
 0x2f0   :  { %837 = vrcp.f32 %v233_v48  ;;  %v245_v54 = vand.u32 2147483648, %v233_v48  ;;  %vm239_vm8 = vweird.f32 %v233_v48  ;;  %v243_v55 = vand.u32 2147483647, %v233_v48 }
 0x2f2   :  { %v246_v57 = vor.u32 1.1754944e-38, %v245_v54  ;;  %vm244_vm10 = vcmp.eq.f32.partialorder %v243_v55, 8.507059e+37  ;;  %v679_v55 = vld [vmem:[#allocation7 + $0x18] sm:$0xff] }
 0x2f3   :  { %702 = vmatpush.msrb.mxu2 %v679_v55 }
 0x2f6   :  { %v838_v49 = vpop.eup %837 }
 0x2f7   :  { %v235_v50 = vmul.f32 %v838_v49, %v233_v48  ;;  %vm240_vm7 = vweird.f32 %v838_v49 }
 0x2f8   :  { %vm241_vm9 = vmor %vm239_vm8, %vm240_vm7 }
 0x2f9   :  { %v236_v51 = vsub.f32 1.0, %v235_v50 }
 0x2fb   :  { %v237_v52 = vmul.f32 %v838_v49, %v236_v51 }
 0x2fd   :  { %v238_v53 = vadd.f32 %v838_v49, %v237_v52 }
 0x2ff   :  { %v242_v56 = vsel %vm241_vm9, %v838_v49, %v238_v53 }
 0x300   :  { %v247_v59 = vsel %vm244_vm10, %v246_v57, %v242_v56  ;;  %v678_v56 = vld [vmem:[#allocation7 + $0x10] sm:$0xff]  ;;  %v677_v57 = vld [vmem:[#allocation7 + $0x8] sm:$0xff] }
 0x301   :  { %v250_v61 = vmul.f32 %v247_v59, %v193_v34  ;;  %703 = vmatpush.msrb.mxu2 %v678_v56 }
 0x303   :  { %704 = vmatpush.msrb.mxu2 %v677_v57 }
 0x346   :  { %v253_v58 = vpop.permute.xlu2 %252 }
 0x347   :  { %v255_v60 = vmul.f32 %v253_v58, %v247_v59  ;;  %v676_v58 = vld [vmem:[#allocation7] sm:$0xff] }
 0x348   :  { %705 = vmatpush.msrb.mxu2 %v676_v58 }
 0x349   :  { %257 = vrot.lane.b32.xlu0 %v255_v60, %s1022_s29 }
 0x3bb   :  { %v258_v62 = vpop.permute.xlu0 %257 }
 0x3bc   :  { %v260_v63 = vadd.f32 %v258_v62, %v250_v61  ;;  %v404_v61 = vld [vmem:[#allocation2 + $0x8] sm:$0x3] }
 0x3be   :  { %839 = vtanh.f32 %v260_v63 }
 0x3c4   :  { %v840_v0 = vpop.eup %839 }
 0x3c5   :  { %263 = vrot.lane.b32.xlu1 %v840_v0, %s1022_s29 }
 0x437   :  { %v264_v1 = vpop.permute.xlu1 %263 }
 0x438   :  { %v266_v2 = vmul.f32 %v264_v1, %v247_v59 }
 0x43a   :  { %268 = vrot.lane.b32.xlu2 %v266_v2, %s1023_s14 }
 0x494   :  { %v269_v3 = vpop.permute.xlu2 %268 }
 0x495   :  { %271 = vst.msk [vmem:[#allocation3 + $0x2] sm:$0x3] %vm204_vm6, %v269_v3  ;;  %796 = vmatmul.msk.f32.vlgmr.msra.gmra.mxu3 %vm134_vm1, %v269_v3 }
 0x518   :  { %v292_v5 = vpop.f32.mrf.mxu3 }
 0x519   :  { %v295_v6 = vadd.f32 %v292_v5, %v272_v4 }
 0x51b   :  { %841 = vtanh.f32 %v295_v6  ;;  %v797_v8 = vmul.f32 -1.442695, %v295_v6 }
 0x51d   :  { %843 = vpow2.f32 %v797_v8 }
 0x521   :  { %v842_v7 = vpop.eup %841 }
 0x522   :  { %318 = vrot.lane.b32.xlu0 %v842_v7, %s1022_s29 }
 0x523   :  { %v844_v9 = vpop.eup %843 }
 0x524   :  { %v299_v10 = vadd.f32 1.0, %v844_v9 }
 0x526   :  { %845 = vrcp.f32 %v299_v10  ;;  %v311_v16 = vand.u32 2147483648, %v299_v10  ;;  %vm305_vm12 = vweird.f32 %v299_v10  ;;  %v309_v17 = vand.u32 2147483647, %v299_v10 }
 0x528   :  { %v312_v19 = vor.u32 1.1754944e-38, %v311_v16  ;;  %vm310_vm14 = vcmp.eq.f32.partialorder %v309_v17, 8.507059e+37 }
 0x52c   :  { %v846_v11 = vpop.eup %845 }
 0x52d   :  { %v301_v12 = vmul.f32 %v846_v11, %v299_v10  ;;  %vm306_vm11 = vweird.f32 %v846_v11 }
 0x52e   :  { %vm307_vm13 = vmor %vm305_vm12, %vm306_vm11 }
 0x52f   :  { %v302_v13 = vsub.f32 1.0, %v301_v12 }
 0x531   :  { %v303_v14 = vmul.f32 %v846_v11, %v302_v13 }
 0x533   :  { %v304_v15 = vadd.f32 %v846_v11, %v303_v14 }
 0x535   :  { %v308_v18 = vsel %vm307_vm13, %v846_v11, %v304_v15 }
 0x536   :  { %v313_v21 = vsel %vm310_vm14, %v312_v19, %v308_v18 }
 0x537   :  { %v316_v23 = vmul.f32 %v313_v21, %v260_v63 }
 0x594   :  { %v319_v20 = vpop.permute.xlu0 %318 }
 0x595   :  { %v321_v22 = vmul.f32 %v319_v20, %v313_v21 }
 0x597   :  { %323 = vrot.lane.b32.xlu1 %v321_v22, %s1022_s29  ;;  %v716_v22 = vld [vmem:[#allocation9 + $0x18] sm:$0xff] }
 0x598   :  { %739 = vmatpush.msra.mxu3 %v716_v22 }
 0x609   :  { %v324_v24 = vpop.permute.xlu1 %323 }
 0x60a   :  { %v326_v25 = vadd.f32 %v324_v24, %v316_v23  ;;  %v715_v23 = vld [vmem:[#allocation9 + $0x10] sm:$0xff]  ;;  %v714_v24 = vld [vmem:[#allocation9 + $0x8] sm:$0xff] }
 0x60b   :  { %740 = vmatpush.msra.mxu3 %v715_v23 }
 0x60c   :  { %847 = vtanh.f32 %v326_v25 }
 0x60d   :  { %741 = vmatpush.msra.mxu3 %v714_v24 }
 0x612   :  { %v848_v26 = vpop.eup %847 }
 0x613   :  { %329 = vrot.lane.b32.xlu2 %v848_v26, %s1022_s29 }
 0x66d   :  { %v330_v27 = vpop.permute.xlu2 %329 }
 0x66e   :  { %v332_v28 = vmul.f32 %v330_v27, %v313_v21  ;;  %v1166_v27 = vld [vmem:[%s1220_s7] ss:$0 sm:$0xff] }
 0x670   :  { %334 = vrot.lane.b32.xlu0 %v332_v28, %s1023_s14 }
 0x6e2   :  { %v335_v29 = vpop.permute.xlu0 %334 }
 0x6e3   :  { %337 = vst.msk [vmem:[#allocation3 + $0x4] sm:$0x3] %vm204_vm6, %v335_v29  ;;  %798 = vmatmul.msk.f32.vlgmr.msrb.gmra.mxu1 %vm134_vm1, %v335_v29 }
 0x760   :  { %v358_v31 = vpop.f32.mrf.mxu1 }
 0x761   :  { %v361_v32 = vadd.f32 %v358_v31, %v338_v30  ;;  %v470_v30 = vld [vmem:[#allocation2 + $0xa] sm:$0x3] }
 0x763   :  { %849 = vtanh.f32 %v361_v32  ;;  %v799_v34 = vmul.f32 -1.442695, %v361_v32 }
 0x765   :  { %851 = vpow2.f32 %v799_v34 }
 0x769   :  { %v850_v33 = vpop.eup %849 }
 0x76a   :  { %384 = vrot.lane.b32.xlu1 %v850_v33, %s1022_s29  ;;  %v1173_v33 = vld [vmem:[%s1222_s9] ss:$0 sm:$0xff]  ;;  %s1024_s9 = smov 96  }
 0x76b   :  { %v852_v35 = vpop.eup %851 }
 0x76c   :  { %v365_v36 = vadd.f32 1.0, %v852_v35 }
 0x76e   :  { %853 = vrcp.f32 %v365_v36  ;;  %v377_v42 = vand.u32 2147483648, %v365_v36  ;;  %vm371_vm2 = vweird.f32 %v365_v36  ;;  %v375_v43 = vand.u32 2147483647, %v365_v36 }
 0x770   :  { %v378_v45 = vor.u32 1.1754944e-38, %v377_v42  ;;  %vm376_vm4 = vcmp.eq.f32.partialorder %v375_v43, 8.507059e+37 }
 0x774   :  { %v854_v37 = vpop.eup %853 }
 0x775   :  { %v367_v38 = vmul.f32 %v854_v37, %v365_v36  ;;  %vm372_vm15 = vweird.f32 %v854_v37 }
 0x776   :  { %vm373_vm3 = vmor %vm371_vm2, %vm372_vm15 }
 0x777   :  { %v368_v39 = vsub.f32 1.0, %v367_v38 }
 0x779   :  { %v369_v40 = vmul.f32 %v854_v37, %v368_v39 }
 0x77b   :  { %v370_v41 = vadd.f32 %v854_v37, %v369_v40 }
 0x77d   :  { %v374_v44 = vsel %vm373_vm3, %v854_v37, %v370_v41 }
 0x77e   :  { %v379_v47 = vsel %vm376_vm4, %v378_v45, %v374_v44 }
 0x77f   :  { %v382_v49 = vmul.f32 %v379_v47, %v326_v25  ;;  %v713_v25 = vld [vmem:[#allocation9] sm:$0xff] }
 0x780   :  { %742 = vmatpush.msra.mxu3 %v713_v25 }
 0x7dc   :  { %v385_v46 = vpop.permute.xlu1 %384 }
 0x7dd   :  { %v387_v48 = vmul.f32 %v385_v46, %v379_v47 }
 0x7df   :  { %389 = vrot.lane.b32.xlu2 %v387_v48, %s1022_s29 }
 0x839   :  { %v390_v50 = vpop.permute.xlu2 %389 }
 0x83a   :  { %v392_v51 = vadd.f32 %v390_v50, %v382_v49 }
 0x83c   :  { %855 = vtanh.f32 %v392_v51 }
 0x842   :  { %v856_v52 = vpop.eup %855 }
 0x843   :  { %395 = vrot.lane.b32.xlu0 %v856_v52, %s1022_s29 }
 0x8b5   :  { %v396_v53 = vpop.permute.xlu0 %395 }
 0x8b6   :  { %v398_v54 = vmul.f32 %v396_v53, %v379_v47 }
 0x8b8   :  { %400 = vrot.lane.b32.xlu1 %v398_v54, %s1023_s14 }
 0x92a   :  { %v401_v59 = vpop.permute.xlu1 %400 }
 0x92b   :  { %403 = vst.msk [vmem:[#allocation3 + $0x6] sm:$0x3] %vm204_vm6, %v401_v59  ;;  %800 = vmatmul.msk.f32.vlgmr.msra.gmra.mxu2 %vm134_vm1, %v401_v59  ;;  %v536_v59 = vld [vmem:[#allocation2 + $0xc] sm:$0x3] }
 0x932   :  { %v674_v60 = vld [vmem:[#allocation3] sm:$0xff] }
 0x933   :  { %808 = vmatmul.msk.f32.vlgmr.msrb.gmra.mxu2 %vm134_vm1, %v674_v60 }
 0x9ae   :  { %v424_v62 = vpop.f32.mrf.mxu2 }
 0x9af   :  { %v427_v63 = vadd.f32 %v424_v62, %v404_v61 }
 0x9b1   :  { %857 = vtanh.f32 %v427_v63  ;;  %v801_v1 = vmul.f32 -1.442695, %v427_v63 }
 0x9b3   :  { %859 = vpow2.f32 %v801_v1 }
 0x9b6   :  { %v707_v28 = vpop.f32.mrf.mxu2 }
 0x9b7   :  { %v858_v0 = vpop.eup %857  ;;  %v708_v29 = vadd.f32 %v1166_v27, %v707_v28 }
 0x9b8   :  { %450 = vrot.lane.b32.xlu2 %v858_v0, %s1022_s29 }
 0x9b9   :  { %v860_v2 = vpop.eup %859 }
 0x9ba   :  { %v431_v3 = vadd.f32 1.0, %v860_v2 }
 0x9bc   :  { %861 = vrcp.f32 %v431_v3  ;;  %v443_v9 = vand.u32 2147483648, %v431_v3  ;;  %vm437_vm7 = vweird.f32 %v431_v3  ;;  %v441_v10 = vand.u32 2147483647, %v431_v3 }
 0x9be   :  { %v444_v12 = vor.u32 1.1754944e-38, %v443_v9  ;;  %vm442_vm9 = vcmp.eq.f32.partialorder %v441_v10, 8.507059e+37 }
 0x9c2   :  { %v862_v4 = vpop.eup %861 }
 0x9c3   :  { %v433_v5 = vmul.f32 %v862_v4, %v431_v3  ;;  %vm438_vm5 = vweird.f32 %v862_v4 }
 0x9c4   :  { %vm439_vm8 = vmor %vm437_vm7, %vm438_vm5 }
 0x9c5   :  { %v434_v6 = vsub.f32 1.0, %v433_v5 }
 0x9c7   :  { %v435_v7 = vmul.f32 %v862_v4, %v434_v6 }
 0x9c9   :  { %v436_v8 = vadd.f32 %v862_v4, %v435_v7 }
 0x9cb   :  { %v440_v11 = vsel %vm439_vm8, %v862_v4, %v436_v8 }
 0x9cc   :  { %v445_v14 = vsel %vm442_vm9, %v444_v12, %v440_v11 }
 0x9cd   :  { %v448_v16 = vmul.f32 %v445_v14, %v392_v51 }
 0xa12   :  { %v451_v13 = vpop.permute.xlu2 %450 }
 0xa13   :  { %v453_v15 = vmul.f32 %v451_v13, %v445_v14 }
 0xa15   :  { %455 = vrot.lane.b32.xlu0 %v453_v15, %s1022_s29 }
 0xa87   :  { %v456_v17 = vpop.permute.xlu0 %455 }
 0xa88   :  { %v458_v18 = vadd.f32 %v456_v17, %v448_v16 }
 0xa8a   :  { %863 = vtanh.f32 %v458_v18 }
 0xa90   :  { %v864_v19 = vpop.eup %863 }
 0xa91   :  { %461 = vrot.lane.b32.xlu1 %v864_v19, %s1022_s29 }
 0xb03   :  { %v462_v20 = vpop.permute.xlu1 %461 }
 0xb04   :  { %v464_v21 = vmul.f32 %v462_v20, %v445_v14 }
 0xb06   :  { %466 = vrot.lane.b32.xlu2 %v464_v21, %s1023_s14  ;;  %v602_v21 = vld [vmem:[#allocation2 + $0xe] sm:$0x3] }
 0xb60   :  { %v467_v26 = vpop.permute.xlu2 %466 }
 0xb61   :  { %469 = vst.msk [vmem:[#allocation3 + $0x8] sm:$0x3] %vm204_vm6, %v467_v26  ;;  %802 = vmatmul.msk.f32.vlgmr.msrb.gmra.mxu3 %vm134_vm1, %v467_v26 }
 0xb69   :  { %810 = vmatmul.msk.f32.vlgmr.msra.gmra.mxu3 %vm134_vm1, %v708_v29 }
 0xbe4   :  { %v490_v31 = vpop.f32.mrf.mxu3 }
 0xbe5   :  { %v493_v32 = vadd.f32 %v490_v31, %v470_v30 }
 0xbe7   :  { %865 = vtanh.f32 %v493_v32  ;;  %v803_v37 = vmul.f32 -1.442695, %v493_v32 }
 0xbe9   :  { %867 = vpow2.f32 %v803_v37 }
 0xbec   :  { %v744_v34 = vpop.f32.mrf.mxu3 }
 0xbed   :  { %v866_v35 = vpop.eup %865  ;;  %v745_v36 = vadd.f32 %v1173_v33, %v744_v34 }
 0xbee   :  { %516 = vrot.lane.b32.xlu0 %v866_v35, %s1022_s29 }
 0xbef   :  { %750 = vst.msk [vmem:[%s1223_s10] sm:$0xff] %vm95_vm0, %v745_v36  ;;  %v868_v38 = vpop.eup %867 }
 0xbf0   :  { %v497_v39 = vadd.f32 1.0, %v868_v38 }
 0xbf2   :  { %869 = vrcp.f32 %v497_v39  ;;  %v509_v45 = vand.u32 2147483648, %v497_v39  ;;  %vm503_vm11 = vweird.f32 %v497_v39  ;;  %v507_v46 = vand.u32 2147483647, %v497_v39 }
 0xbf4   :  { %v510_v48 = vor.u32 1.1754944e-38, %v509_v45  ;;  %vm508_vm13 = vcmp.eq.f32.partialorder %v507_v46, 8.507059e+37 }
 0xbf8   :  { %v870_v40 = vpop.eup %869 }
 0xbf9   :  { %v499_v41 = vmul.f32 %v870_v40, %v497_v39  ;;  %vm504_vm10 = vweird.f32 %v870_v40 }
 0xbfa   :  { %vm505_vm12 = vmor %vm503_vm11, %vm504_vm10 }
 0xbfb   :  { %v500_v42 = vsub.f32 1.0, %v499_v41 }
 0xbfd   :  { %v501_v43 = vmul.f32 %v870_v40, %v500_v42 }
 0xbff   :  { %v502_v44 = vadd.f32 %v870_v40, %v501_v43 }
 0xc01   :  { %v506_v47 = vsel %vm505_vm12, %v870_v40, %v502_v44 }
 0xc02   :  { %v511_v50 = vsel %vm508_vm13, %v510_v48, %v506_v47 }
 0xc03   :  { %v514_v52 = vmul.f32 %v511_v50, %v458_v18 }
 0xc60   :  { %v517_v49 = vpop.permute.xlu0 %516 }
 0xc61   :  { %v519_v51 = vmul.f32 %v517_v49, %v511_v50 }
 0xc63   :  { %521 = vrot.lane.b32.xlu1 %v519_v51, %s1022_s29 }
 0xcd5   :  { %v522_v53 = vpop.permute.xlu1 %521 }
 0xcd6   :  { %v524_v54 = vadd.f32 %v522_v53, %v514_v52 }
 0xcd8   :  { %871 = vtanh.f32 %v524_v54 }
 0xcde   :  { %v872_v55 = vpop.eup %871 }
 0xcdf   :  { %527 = vrot.lane.b32.xlu2 %v872_v55, %s1022_s29 }
 0xd39   :  { %v528_v56 = vpop.permute.xlu2 %527 }
 0xd3a   :  { %v530_v57 = vmul.f32 %v528_v56, %v511_v50 }
 0xd3c   :  { %532 = vrot.lane.b32.xlu0 %v530_v57, %s1023_s14 }
 0xdae   :  { %v533_v58 = vpop.permute.xlu0 %532 }
 0xdaf   :  { %535 = vst.msk [vmem:[#allocation3 + $0xa] sm:$0x3] %vm204_vm6, %v533_v58  ;;  %804 = vmatmul.msk.f32.vlgmr.msra.gmra.mxu0 %vm134_vm1, %v533_v58 }
 0xe2c   :  { %v556_v60 = vpop.f32.mrf.mxu0 }
 0xe2d   :  { %v559_v61 = vadd.f32 %v556_v60, %v536_v59 }
 0xe2f   :  { %873 = vtanh.f32 %v559_v61  ;;  %v805_v63 = vmul.f32 -1.442695, %v559_v61 }
 0xe31   :  { %875 = vpow2.f32 %v805_v63 }
 0xe35   :  { %v874_v62 = vpop.eup %873 }
 0xe36   :  { %582 = vrot.lane.b32.xlu1 %v874_v62, %s1022_s29 }
 0xe37   :  { %v876_v0 = vpop.eup %875 }
 0xe38   :  { %v563_v1 = vadd.f32 1.0, %v876_v0 }
 0xe3a   :  { %877 = vrcp.f32 %v563_v1  ;;  %v575_v7 = vand.u32 2147483648, %v563_v1  ;;  %vm569_vm15 = vweird.f32 %v563_v1  ;;  %v573_v8 = vand.u32 2147483647, %v563_v1 }
 0xe3c   :  { %v576_v10 = vor.u32 1.1754944e-38, %v575_v7  ;;  %vm574_vm3 = vcmp.eq.f32.partialorder %v573_v8, 8.507059e+37 }
 0xe40   :  { %v878_v2 = vpop.eup %877 }
 0xe41   :  { %v565_v3 = vmul.f32 %v878_v2, %v563_v1  ;;  %vm570_vm14 = vweird.f32 %v878_v2 }
 0xe42   :  { %vm571_vm2 = vmor %vm569_vm15, %vm570_vm14 }
 0xe43   :  { %v566_v4 = vsub.f32 1.0, %v565_v3 }
 0xe45   :  { %v567_v5 = vmul.f32 %v878_v2, %v566_v4 }
 0xe47   :  { %v568_v6 = vadd.f32 %v878_v2, %v567_v5 }
 0xe49   :  { %v572_v9 = vsel %vm571_vm2, %v878_v2, %v568_v6 }
 0xe4a   :  { %v577_v12 = vsel %vm574_vm3, %v576_v10, %v572_v9 }
 0xe4b   :  { %v580_v14 = vmul.f32 %v577_v12, %v524_v54 }
 0xea8   :  { %v583_v11 = vpop.permute.xlu1 %582 }
 0xea9   :  { %v585_v13 = vmul.f32 %v583_v11, %v577_v12 }
 0xeab   :  { %587 = vrot.lane.b32.xlu2 %v585_v13, %s1022_s29 }
 0xf05   :  { %v588_v15 = vpop.permute.xlu2 %587 }
 0xf06   :  { %v590_v16 = vadd.f32 %v588_v15, %v580_v14 }
 0xf08   :  { %879 = vtanh.f32 %v590_v16 }
 0xf0e   :  { %v880_v17 = vpop.eup %879 }
 0xf0f   :  { %593 = vrot.lane.b32.xlu0 %v880_v17, %s1022_s29 }
 0xf81   :  { %v594_v18 = vpop.permute.xlu0 %593 }
 0xf82   :  { %v596_v19 = vmul.f32 %v594_v18, %v577_v12 }
 0xf84   :  { %598 = vrot.lane.b32.xlu1 %v596_v19, %s1023_s14 }
 0xff6   :  { %v599_v20 = vpop.permute.xlu1 %598 }
 0xff7   :  { %601 = vst.msk [vmem:[#allocation3 + $0xc] sm:$0x3] %vm204_vm6, %v599_v20  ;;  %806 = vmatmul.msk.f32.vlgmr.msra.gmra.mxu1 %vm134_vm1, %v599_v20 }
0x1074   :  { %v622_v22 = vpop.f32.mrf.mxu1 }
0x1075   :  { %v625_v23 = vadd.f32 %v622_v22, %v602_v21 }
0x1077   :  { %881 = vtanh.f32 %v625_v23  ;;  %v807_v25 = vmul.f32 -1.442695, %v625_v23 }
0x1079   :  { %883 = vpow2.f32 %v807_v25 }
0x107d   :  { %v882_v24 = vpop.eup %881 }
0x107e   :  { %648 = vrot.lane.b32.xlu2 %v882_v24, %s1022_s29 }
0x107f   :  { %v884_v26 = vpop.eup %883 }
0x1080   :  { %v629_v28 = vadd.f32 1.0, %v884_v26 }
0x1082   :  { %885 = vrcp.f32 %v629_v28  ;;  %v641_v35 = vand.u32 2147483648, %v629_v28  ;;  %vm635_vm5 = vweird.f32 %v629_v28  ;;  %v639_v36 = vand.u32 2147483647, %v629_v28 }
0x1084   :  { %v642_v38 = vor.u32 1.1754944e-38, %v641_v35  ;;  %vm640_vm8 = vcmp.eq.f32.partialorder %v639_v36, 8.507059e+37 }
0x1088   :  { %v886_v29 = vpop.eup %885 }
0x1089   :  { %v631_v30 = vmul.f32 %v886_v29, %v629_v28  ;;  %vm636_vm4 = vweird.f32 %v886_v29 }
0x108a   :  { %vm637_vm7 = vmor %vm635_vm5, %vm636_vm4 }
0x108b   :  { %v632_v31 = vsub.f32 1.0, %v631_v30 }
0x108d   :  { %v633_v32 = vmul.f32 %v886_v29, %v632_v31 }
0x108f   :  { %v634_v34 = vadd.f32 %v886_v29, %v633_v32 }
0x1091   :  { %v638_v37 = vsel %vm637_vm7, %v886_v29, %v634_v34 }
0x1092   :  { %v643_v40 = vsel %vm640_vm8, %v642_v38, %v638_v37 }
0x1093   :  { %v646_v42 = vmul.f32 %v643_v40, %v590_v16 }
0x10d8   :  { %v649_v39 = vpop.permute.xlu2 %648 }
0x10d9   :  { %v651_v41 = vmul.f32 %v649_v39, %v643_v40 }
0x10db   :  { %653 = vrot.lane.b32.xlu0 %v651_v41, %s1022_s29 }
0x114d   :  { %v654_v43 = vpop.permute.xlu0 %653 }
0x114e   :  { %v656_v44 = vadd.f32 %v654_v43, %v646_v42 }
0x1150   :  { %887 = vtanh.f32 %v656_v44  ;;  %670 = vrot.lane.b32.xlu0 %v656_v44, %s1024_s9 }
0x1156   :  { %v888_v45 = vpop.eup %887 }
0x1157   :  { %659 = vrot.lane.b32.xlu1 %v888_v45, %s1022_s29 }
0x11c2   :  { %v671_v46 = vpop.permute.xlu0 %670 }
0x11c3   :  { %673 = vst.msk [vmem:[#allocation11] sm:$0x3] %vm204_vm6, %v671_v46 }
0x11c4   :  { %775 = dma.vmem_to_hbm [thread:$0]  %s771_s22, 32, %s773_s25, [#allocation12]  }
0x11c9   :  { %v660_v47 = vpop.permute.xlu1 %659 }
0x11ca   :  { %v662_v48 = vmul.f32 %v660_v47, %v643_v40 }
0x11cc   :  { %664 = vrot.lane.b32.xlu2 %v662_v48, %s1023_s14 }
0x1226   :  { %v665_v49 = vpop.permute.xlu2 %664 }
0x1227   :  { %667 = vst.msk [vmem:[#allocation3 + $0xe] sm:$0x3] %vm204_vm6, %v665_v49 }
0x1228   :  { %668 = vst.msk [vmem:[#allocation10] sm:$0x3] %vm204_vm6, %v665_v49 }
0x1229   :  { %764 = dma.vmem_to_hbm [thread:$0]  %s760_s3, 32, %s762_s20, [#allocation6]  }
0x122e   :  { %v675_v50 = vld [vmem:[#allocation3 + $0x8] sm:$0xff] }
0x122f   :  { %809 = vmatmul.msk.f32.gmra.mxu2 %vm134_vm1, %v675_v50 }
0x12b2   :  { %v710_v51 = vpop.f32.mrf.mxu2 }
0x12b3   :  { %v711_v52 = vadd.f32 %v1166_v27, %v710_v51 }
0x12b5   :  { %811 = vmatmul.msk.f32.gmra.mxu3 %vm134_vm1, %v711_v52 }
0x1338   :  { %v747_v27 = vpop.f32.mrf.mxu3 }
0x1339   :  { %v748_v53 = vadd.f32 %v1173_v33, %v747_v27 }
0x133b   :  { %751 = vst.msk [vmem:[%s1223_s10 + $0x8] sm:$0xff] %vm95_vm0, %v748_v53 }
0x133c   :  { %1013 = dma.done.wait [#allocation6], 32  }
0x133d   :  { %1014 = vsyncadd [#allocation6], 4294967264 }
0x133e   :  { %1015 = dma.done.wait [#allocation12], 32  }
0x133f   :  { %1016 = vsyncadd [#allocation12], 4294967264 }
0x1340   :  { %786 = vsyncpa [#allocation5], 1 }
0x1341   :  { %787 = vsyncpa [#allocation8], 1 }
0x1342   :  { %788 = vsyncpa [#allocation6], 1 }
0x1343   :  { %789 = vsyncpa [#allocation12], 1 }

</bundles_post_ra>
